<compile_context>
chip_gen: v7x
topology: tpu7x:2x2x1
jax: 0.10.0
libtpu: 0.0.40
codegen_flags: <defaults>
</compile_context>

<pallas_src>
import functools

import jax
import jax.numpy as jnp
import numpy as np
from jax.experimental import pallas as pl
from jax.experimental.pallas import tpu as pltpu


def _round_up(x, m):
    return ((x + m - 1) // m) * m


def _pick_t_tile(T, cap=8192):
    """Large T tiles: whole T if it fits, else the largest 128-multiple divisor
    of T that is <= cap, else cap with a ragged (masked) tail."""
    if T <= cap:
        return T
    for cand in (8192, 4096, 2048, 1024, 512, 256, 128):
        if cand <= cap and T % cand == 0:
            return cand
    return cap


def _fsq_stats_kernel(win_ref, z_ref, stats_ref, *, C, T, t_tile):
    """Pass 1: per-batch partial sum / sum-of-squares of y = project_in(z).

    win_ref  : VMEM (E_pad, C+1); cols 0..C-1 = W_in^T, col C = b_in.
    z_ref    : VMEM (1, C, t_tile) block of z in native (B, C, T) layout.
    stats_ref: VMEM (1, E_pad, 128) per-batch accumulator (revisited block);
               column 0 = sum, column 1 = sum of squares (rows = features).
    """
    j = pl.program_id(1)

    @pl.when(j == 0)
    def _init():
        stats_ref[...] = jnp.zeros_like(stats_ref)

    z = z_ref[0]                                           # (C, t)

    # Stacked project_in: y[e, t] = sum_c W[e, c] * z[c, t] + b[e].
    y = win_ref[:, C:C + 1] + win_ref[:, 0:1] * z[0:1, :]
    for c in range(1, C):
        y = y + win_ref[:, c:c + 1] * z[c:c + 1, :]

    if T % t_tile != 0:                                    # ragged tail: mask OOB lanes
        lane = jax.lax.broadcasted_iota(jnp.int32, (1, t_tile), 1)
        valid = (j * t_tile + lane) < T
        y = jnp.where(valid, y, 0.0)

    stats_ref[0, :, 0:1] += jnp.sum(y, axis=1, keepdims=True)
    stats_ref[0, :, 1:2] += jnp.sum(y * y, axis=1, keepdims=True)


def _fsq_apply_kernel(wf_ref, wo_ref, z_ref, zhat_ref, hist_ref, sse_acc, *,
                      C, E, A_pad, Lb_pad, T, t_tile):
    """Pass 2: folded project_in+BN -> FSQ quantize -> factored histogram ->
    project_out -> commit-loss SSE, for one (batch, T-tile) block.

    wf_ref : VMEM (E_pad, C+7).  Columns: 0..C-1 folded W^T, C folded bias,
             C+1 half_l, C+2 offset, C+3 shift, C+4 1/half_width,
             C+5 half_width, C+6 prefix basis (0 for the last level).
    wo_ref : VMEM (C, E+1).  Columns 0..E-1 = W_out^T, column E = b_out.
    z_ref  : VMEM (1, C, t_tile);  zhat_ref: same shape (lane-dense store).
    hist_ref: VMEM (1, Lb_pad, A_pad) per-batch accumulator (revisited block);
              rows 0..Lb-1 = joint histogram split by last-level digit, row
              Lb_pad-1 col 0 = commit-loss SSE (written at the last T tile).
    sse_acc : VMEM (1, 1) scratch accumulator for the SSE.
    """
    j = pl.program_id(1)
    ragged = (T % t_tile) != 0

    @pl.when(j == 0)
    def _init():
        hist_ref[...] = jnp.zeros_like(hist_ref)
        sse_acc[...] = jnp.zeros_like(sse_acc)

    z = z_ref[0]                                           # (C, t)

    # Per-feature parameter columns, loaded/broadcast once per step.
    bf = wf_ref[:, C + 0:C + 1]
    half_l = wf_ref[:, C + 1:C + 2]
    offset = wf_ref[:, C + 2:C + 3]
    shift = wf_ref[:, C + 3:C + 4]
    inv_hw = wf_ref[:, C + 4:C + 5]
    hw = wf_ref[:, C + 5:C + 6]
    basis_a = wf_ref[:, C + 6:C + 7]

    # Fused project_in + BatchNorm (weights folded in the wrapper), stacked rows.
    y = bf + wf_ref[:, 0:1] * z[0:1, :]
    for c in range(1, C):
        y = y + wf_ref[:, c:c + 1] * z[c:c + 1, :]

    if ragged:
        lane = jax.lax.broadcasted_iota(jnp.int32, (1, t_tile), 1)
        valid = (j * t_tile + lane) < T
        y = jnp.where(valid, y, 0.0)

    # FSQ bound/quantize.  NOTE: matches the PyTorch module exactly:
    # shift = tan(offset / half_l)  (the module uses .tan(), not atanh).
    bounded = jnp.tanh(y + shift) * half_l - offset        # (E_pad, t)
    q = jnp.round(bounded)                                 # round_ste forward
    zq = q * inv_hw                                        # codes in [-1, 1]
    s = q + hw                                             # non-centered digits

    # Factored code index: idx = a + A*b with a = prefix digits dotted with the
    # basis and b = last-level digit.  Two small one-hots replace a dense
    # (n_e, t) compare.
    a_val = jnp.sum(s * basis_a, axis=0, keepdims=True).astype(jnp.int32)  # (1, t)
    b_val = s[E - 1:E, :].astype(jnp.int32)                                # (1, t)

    bins_a = jax.lax.broadcasted_iota(jnp.int32, (A_pad, t_tile), 0)
    onehot_a = jnp.where(bins_a == a_val, 1.0, 0.0)        # (A_pad, t)
    if ragged:
        onehot_a = jnp.where(valid, onehot_a, 0.0)
    bins_b = jax.lax.broadcasted_iota(jnp.int32, (Lb_pad, t_tile), 0)
    onehot_b = jnp.where(bins_b == b_val, 1.0, 0.0)        # (Lb_pad, t)

    # Joint histogram partial on the otherwise idle MXU: contract over t.
    hist_step = jax.lax.dot_general(
        onehot_b, onehot_a, (((1,), (1,)), ((), ())),
        preferred_element_type=jnp.float32)                # (Lb_pad, A_pad)
    hist_ref[0] += hist_step

    # project_out back to the code_dim rows (stacked broadcast FMAs).
    out = wo_ref[:, E:E + 1] + wo_ref[:, 0:1] * zq[0:1, :]
    for e in range(1, E):
        out = out + wo_ref[:, e:e + 1] * zq[e:e + 1, :]
    zhat_ref[0] = out

    # commit-loss SSE partial (masked on the ragged tail).
    diff = z - out
    if ragged:
        diff = jnp.where(valid, diff, 0.0)
    sse_acc[...] += jnp.sum(jnp.sum(diff * diff, axis=0, keepdims=True),
                            axis=1, keepdims=True)

    @pl.when(j == pl.num_programs(1) - 1)
    def _finalize():
        # Stash the per-batch SSE in the spare (always-zero) sublane row of the
        # histogram block: no separate scalar output / DMA stream.
        hist_ref[0, Lb_pad - 1:Lb_pad, 0:1] = sse_acc[...]


def fsq_forward(z, levels, w_in, b_in, bn_w, bn_b, w_out, b_out):
    """FSQuantizer forward.

    z     : (B, code_dim, T) float32, the module's native "b c t" layout.
    w_in  : (code_dim, e_dim)  [= PyTorch project_in.weight.T],  b_in: (1, e_dim)
    bn_w, bn_b: (1, e_dim)     BatchNorm1d affine params (training-mode stats)
    w_out : (e_dim, code_dim)  [= PyTorch project_out.weight.T], b_out: (1, code_dim)
    Returns (zhat (B, code_dim, T), commit_loss, perplexity).
    """
    B, C, T = z.shape
    E = len(levels)
    assert all(int(l) >= 2 for l in levels), "levels must be >= 2 (half_width > 0)"

    n_e = int(np.prod(levels))
    A = int(np.prod(levels[:-1])) if E > 1 else 1          # prefix-group size
    Lb = int(levels[-1])                                   # last-level size
    assert n_e == A * Lb
    A_pad = _round_up(max(A, 8), 8)
    Lb_pad = _round_up(Lb + 1, 8)                          # +1 spare row carries the SSE
    E_pad = _round_up(max(E, 8), 8)
    N = B * T

    t_tile = _pick_t_tile(T)
    nT = pl.cdiv(T, t_tile)

    z = z.astype(jnp.float32)
    w_in = jnp.asarray(w_in, jnp.float32).reshape(C, E)
    b_in = jnp.asarray(b_in, jnp.float32).reshape(E)
    bn_w = jnp.asarray(bn_w, jnp.float32).reshape(E)
    bn_b = jnp.asarray(bn_b, jnp.float32).reshape(E)
    w_out = jnp.asarray(w_out, jnp.float32).reshape(E, C)
    b_out = jnp.asarray(b_out, jnp.float32).reshape(C)

    # Static FSQ constants.
    lv = np.asarray(levels, np.float64)
    eps = 1e-3
    half_l = (lv - 1.0) * (1.0 - eps) / 2.0
    offset = np.where(lv % 2 == 0, 0.5, 0.0)
    shift = np.tan(offset / half_l)                        # module uses .tan()
    half_width = np.floor(lv / 2.0)
    basis = np.cumprod(np.concatenate([[1.0], lv[:-1]]))
    basis_a = np.where(np.arange(E) < E - 1, basis, 0.0)   # prefix digits only

    z_spec = pl.BlockSpec((1, C, t_tile), lambda b, j: (b, 0, j))
    params = pltpu.CompilerParams(dimension_semantics=("parallel", "arbitrary"))

    # ---- pass 1: BatchNorm batch statistics of project_in(z) ----
    win_all = jnp.zeros((E_pad, C + 1), jnp.float32)
    win_all = win_all.at[:E, :C].set(w_in.T)
    win_all = win_all.at[:E, C].set(b_in)

    stats = pl.pallas_call(
        functools.partial(_fsq_stats_kernel, C=C, T=T, t_tile=t_tile),
        grid=(B, nT),
        in_specs=[pl.BlockSpec((E_pad, C + 1), lambda b, j: (0, 0)), z_spec],
        out_specs=pl.BlockSpec((1, E_pad, 128), lambda b, j: (b, 0, 0)),
        out_shape=jax.ShapeDtypeStruct((B, E_pad, 128), jnp.float32),
        compiler_params=params,
    )(win_all, z)

    sums = jnp.sum(stats[:, :E, 0], axis=0)
    sqs = jnp.sum(stats[:, :E, 1], axis=0)
    mean = sums / N
    var = jnp.maximum(sqs / N - mean * mean, 0.0)          # biased batch variance
    inv_std = jax.lax.rsqrt(var + 1e-5)
    # TODO(synk): BatchNorm1d running_mean/running_var buffer updates (training
    # side effect) are not modeled; they do not affect the forward outputs.

    # ---- fold project_in + BatchNorm(affine) into one linear map ----
    scale = bn_w * inv_std
    wf = w_in * scale[None, :]                             # (C, E)
    bf = (b_in - mean) * scale + bn_b                      # (E,)

    wf_all = jnp.zeros((E_pad, C + 7), jnp.float32)
    wf_all = wf_all.at[:E, :C].set(wf.T)
    wf_all = wf_all.at[:E, C + 0].set(bf)
    wf_all = wf_all.at[:E, C + 1].set(jnp.asarray(half_l, jnp.float32))
    wf_all = wf_all.at[:E, C + 2].set(jnp.asarray(offset, jnp.float32))
    wf_all = wf_all.at[:E, C + 3].set(jnp.asarray(shift, jnp.float32))
    wf_all = wf_all.at[:E, C + 4].set(jnp.asarray(1.0 / half_width, jnp.float32))
    wf_all = wf_all.at[:E, C + 5].set(jnp.asarray(half_width, jnp.float32))
    wf_all = wf_all.at[:E, C + 6].set(jnp.asarray(basis_a, jnp.float32))

    wo_all = jnp.zeros((C, E + 1), jnp.float32)
    wo_all = wo_all.at[:, :E].set(w_out.T)
    wo_all = wo_all.at[:, E].set(b_out)

    # ---- pass 2: quantize / histogram / project_out / SSE ----
    zhat, hist = pl.pallas_call(
        functools.partial(_fsq_apply_kernel, C=C, E=E, A_pad=A_pad,
                          Lb_pad=Lb_pad, T=T, t_tile=t_tile),
        grid=(B, nT),
        in_specs=[
            pl.BlockSpec((E_pad, C + 7), lambda b, j: (0, 0)),
            pl.BlockSpec((C, E + 1), lambda b, j: (0, 0)),
            z_spec,
        ],
        out_specs=[
            pl.BlockSpec((1, C, t_tile), lambda b, j: (b, 0, j)),
            pl.BlockSpec((1, Lb_pad, A_pad), lambda b, j: (b, 0, 0)),
        ],
        out_shape=(
            jax.ShapeDtypeStruct((B, C, T), jnp.float32),         # zhat (native layout)
            jax.ShapeDtypeStruct((B, Lb_pad, A_pad), jnp.float32),  # hist + SSE per batch
        ),
        scratch_shapes=[pltpu.VMEM((1, 1), jnp.float32)],
        compiler_params=params,
    )(wf_all, wo_all, z)

    # ---- tiny finalization on per-batch partials (plain JAX) ----
    # counts[b_digit, a] -> flat index b_digit*A + a == codes_to_indices order.
    counts = jnp.sum(hist[:, :Lb, :A].astype(jnp.int32), axis=0)   # exact int counts
    e_mean = counts.reshape(Lb * A).astype(jnp.float32) / N        # (n_e,)
    perplexity = jnp.exp(-jnp.sum(e_mean * jnp.log(e_mean + 1e-10)))
    sse = jnp.sum(hist[:, Lb_pad - 1, 0])
    commit_loss = sse / (B * C * T)
    return zhat, commit_loss, perplexity


def _fsq_reference(z, levels, w_in, b_in, bn_w, bn_b, w_out, b_out):
    """Pure-JAX reference of the PyTorch module forward (for verification)."""
    B, C, T = z.shape
    E = len(levels)
    lv = jnp.asarray(levels, jnp.float32)
    zf = jnp.transpose(z, (0, 2, 1)).reshape(B * T, C)     # 'n c t -> (n t) c'
    y = zf @ w_in.reshape(C, E) + b_in.reshape(1, E)
    mean = jnp.mean(y, axis=0)
    var = jnp.mean((y - mean) ** 2, axis=0)                # biased batch variance
    y = (y - mean) * jax.lax.rsqrt(var + 1e-5) * bn_w.reshape(1, E) + bn_b.reshape(1, E)
    eps = 1e-3
    half_l = (lv - 1.0) * (1.0 - eps) / 2.0
    offset = jnp.where(lv % 2 == 0, 0.5, 0.0)
    shift = jnp.tan(offset / half_l)
    bounded = jnp.tanh(y + shift) * half_l - offset
    q = jnp.round(bounded)
    half_width = jnp.floor(lv / 2.0)
    zq = q / half_width
    basis = jnp.asarray(np.cumprod([1] + list(levels[:-1])), jnp.float32)
    idx = jnp.sum((zq * half_width + half_width) * basis, axis=-1).astype(jnp.int32)
    zhat = zq @ w_out.reshape(E, C) + b_out.reshape(1, C)
    zhat = jnp.transpose(zhat.reshape(B, T, C), (0, 2, 1))
    commit_loss = jnp.mean((z - zhat) ** 2)
    onehot = jax.nn.one_hot(idx, int(np.prod(levels)), dtype=jnp.float32)
    e_mean = jnp.mean(onehot, axis=0)
    perplexity = jnp.exp(-jnp.sum(e_mean * jnp.log(e_mean + 1e-10)))
    return zhat, commit_loss, perplexity


if __name__ == "__main__":
    # Module config: code_dim=4, levels=[8, 5, 5] => e_dim=3 (projections active),
    # n_e = 200.  Input z is (B, code_dim, T) ("b c t").
    B, CODE_DIM, T = 2, 4, 16
    LEVELS = [8, 5, 5]
    E_DIM = len(LEVELS)

    key = jax.random.PRNGKey(0)
    k_z, k_wi, k_bi, k_wo, k_bo = jax.random.split(key, 5)

    z = jax.random.normal(k_z, (B, CODE_DIM, T), dtype=jnp.float32)

    # Deterministic parameter init (shapes from __init__); weights stored
    # pre-transposed relative to PyTorch's Linear.weight:
    w_in = 0.3 * jax.random.normal(k_wi, (CODE_DIM, E_DIM), dtype=jnp.float32)
    b_in = 0.1 * jax.random.normal(k_bi, (1, E_DIM), dtype=jnp.float32)
    w_out = 0.3 * jax.random.normal(k_wo, (E_DIM, CODE_DIM), dtype=jnp.float32)
    b_out = 0.1 * jax.random.normal(k_bo, (1, CODE_DIM), dtype=jnp.float32)
    bn_w = jnp.ones((1, E_DIM), dtype=jnp.float32)         # PyTorch BN default init
    bn_b = jnp.zeros((1, E_DIM), dtype=jnp.float32)

    fwd = jax.jit(lambda *a: fsq_forward(a[0], LEVELS, *a[1:]))
    zhat, commit_loss, perplexity = fwd(z, w_in, b_in, bn_w, bn_b, w_out, b_out)
    jax.block_until_ready((zhat, commit_loss, perplexity))

    assert zhat.shape == (B, CODE_DIM, T)
    assert commit_loss.shape == () and perplexity.shape == ()

    # Cross-check against a pure-JAX reference of the module forward.
    zr, cr, pr = _fsq_reference(z, LEVELS, w_in, b_in, bn_w, bn_b, w_out, b_out)
    np.testing.assert_allclose(np.asarray(zhat), np.asarray(zr), atol=1e-3, rtol=1e-3)
    np.testing.assert_allclose(float(commit_loss), float(cr), atol=1e-3, rtol=1e-3)
    np.testing.assert_allclose(float(perplexity), float(pr), atol=1e-3, rtol=1e-3)

    print("KERNEL_OK")
</pallas_src>

<mosaic_0001>
module attributes {stable_mosaic.version = 11 : i64} {
  func.func @_fsq_stats_kernel(%arg0: i32, %arg1: i32, %arg2: memref<8x5xf32, #tpu.memory_space<vmem>>, %arg3: memref<1x4x16xf32, #tpu.memory_space<vmem>>, %arg4: memref<1x8x128xf32, #tpu.memory_space<vmem>>) attributes {dimension_semantics = [#tpu.dimension_semantics<parallel>, #tpu.dimension_semantics<arbitrary>], iteration_bounds = array<i64: 2, 1>, scalar_prefetch = 0 : i64, scratch_operands = 0 : i64, tpu.core_type = #tpu.core_type<tc>, window_params = [{pipeline_mode = #tpu.pipeline_mode<synchronous>, transform_indices = @transform_0, window_bounds = array<i64: 8, 5>}, {transform_indices = @transform_1, window_bounds = array<i64: 1, 4, 16>}, {transform_indices = @transform_2, window_bounds = array<i64: 1, 8, 128>}]} {
    %c0_i32 = arith.constant 0 : i32
    %0 = arith.cmpi eq, %arg1, %c0_i32 : i32
    %1 = arith.extui %0 : i1 to i32
    %c0_i32_0 = arith.constant 0 : i32
    %2 = arith.cmpi ne, %1, %c0_i32_0 : i32
    scf.if %2 {
      %cst_22 = arith.constant 0.000000e+00 : f32
      %48 = vector.broadcast %cst_22 : f32 to vector<1x8x128xf32>
      %c0_23 = arith.constant 0 : index
      %c0_24 = arith.constant 0 : index
      %c0_25 = arith.constant 0 : index
      %49 = vector.load %arg4[%c0_23, %c0_24, %c0_25] : memref<1x8x128xf32, #tpu.memory_space<vmem>>, vector<1x8x128xf32>
      tpu.vector_store %arg4[%c0_23, %c0_24, %c0_25], %48 {strides = array<i32>} : memref<1x8x128xf32, #tpu.memory_space<vmem>>, vector<1x8x128xf32>,
    } else {
    }
    %c0 = arith.constant 0 : index
    %c0_1 = arith.constant 0 : index
    %c0_2 = arith.constant 0 : index
    %3 = vector.load %arg3[%c0, %c0_1, %c0_2] : memref<1x4x16xf32, #tpu.memory_space<vmem>>, vector<1x4x16xf32>
    %4 = vector.shape_cast %3 : vector<1x4x16xf32> to vector<4x16xf32>
    %c0_3 = arith.constant 0 : index
    %c4 = arith.constant 4 : index
    %5 = vector.load %arg2[%c0_3, %c4] : memref<8x5xf32, #tpu.memory_space<vmem>>, vector<8x1xf32>
    %c0_4 = arith.constant 0 : index
    %c0_5 = arith.constant 0 : index
    %6 = vector.load %arg2[%c0_4, %c0_5] : memref<8x5xf32, #tpu.memory_space<vmem>>, vector<8x1xf32>
    %7 = vector.extract_strided_slice %4 {offsets = [0, 0], sizes = [1, 16], strides = [1, 1]} : vector<4x16xf32> to vector<1x16xf32>
    %8 = vector.broadcast %6 : vector<8x1xf32> to vector<8x16xf32>
    %9 = vector.broadcast %7 : vector<1x16xf32> to vector<8x16xf32>
    %10 = arith.mulf %8, %9 : vector<8x16xf32>
    %11 = vector.broadcast %5 : vector<8x1xf32> to vector<8x16xf32>
    %12 = arith.addf %11, %10 : vector<8x16xf32>
    %c0_6 = arith.constant 0 : index
    %c1 = arith.constant 1 : index
    %13 = vector.load %arg2[%c0_6, %c1] : memref<8x5xf32, #tpu.memory_space<vmem>>, vector<8x1xf32>
    %14 = vector.extract_strided_slice %4 {offsets = [1, 0], sizes = [1, 16], strides = [1, 1]} : vector<4x16xf32> to vector<1x16xf32>
    %15 = vector.broadcast %13 : vector<8x1xf32> to vector<8x16xf32>
    %16 = vector.broadcast %14 : vector<1x16xf32> to vector<8x16xf32>
    %17 = arith.mulf %15, %16 : vector<8x16xf32>
    %18 = arith.addf %12, %17 : vector<8x16xf32>
    %c0_7 = arith.constant 0 : index
    %c2 = arith.constant 2 : index
    %19 = vector.load %arg2[%c0_7, %c2] : memref<8x5xf32, #tpu.memory_space<vmem>>, vector<8x1xf32>
    %20 = vector.extract_strided_slice %4 {offsets = [2, 0], sizes = [1, 16], strides = [1, 1]} : vector<4x16xf32> to vector<1x16xf32>
    %21 = vector.broadcast %19 : vector<8x1xf32> to vector<8x16xf32>
    %22 = vector.broadcast %20 : vector<1x16xf32> to vector<8x16xf32>
    %23 = arith.mulf %21, %22 : vector<8x16xf32>
    %24 = arith.addf %18, %23 : vector<8x16xf32>
    %c0_8 = arith.constant 0 : index
    %c3 = arith.constant 3 : index
    %25 = vector.load %arg2[%c0_8, %c3] : memref<8x5xf32, #tpu.memory_space<vmem>>, vector<8x1xf32>
    %26 = vector.extract_strided_slice %4 {offsets = [3, 0], sizes = [1, 16], strides = [1, 1]} : vector<4x16xf32> to vector<1x16xf32>
    %27 = vector.broadcast %25 : vector<8x1xf32> to vector<8x16xf32>
    %28 = vector.broadcast %26 : vector<1x16xf32> to vector<8x16xf32>
    %29 = arith.mulf %27, %28 : vector<8x16xf32>
    %30 = arith.addf %24, %29 : vector<8x16xf32>
    %c0_9 = arith.constant 0 : index
    %c0_10 = arith.constant 0 : index
    %c0_11 = arith.constant 0 : index
    %31 = vector.load %arg4[%c0_9, %c0_10, %c0_11] : memref<1x8x128xf32, #tpu.memory_space<vmem>>, vector<1x8x1xf32>
    %32 = vector.shape_cast %31 : vector<1x8x1xf32> to vector<8x1xf32>
    %cst = arith.constant dense<0.000000e+00> : vector<8xf32>
    %33 = vector.multi_reduction <add>, %30, %cst [1] : vector<8x16xf32> to vector<8xf32>
    %34 = vector.shape_cast %33 : vector<8xf32> to vector<8x1xf32>
    %35 = arith.addf %32, %34 : vector<8x1xf32>
    %c0_12 = arith.constant 0 : index
    %c0_13 = arith.constant 0 : index
    %c0_14 = arith.constant 0 : index
    %36 = vector.load %arg4[%c0_12, %c0_13, %c0_14] : memref<1x8x128xf32, #tpu.memory_space<vmem>>, vector<1x8x1xf32>
    %37 = vector.shape_cast %36 : vector<1x8x1xf32> to vector<8x1xf32>
    %38 = vector.shape_cast %35 : vector<8x1xf32> to vector<1x8x1xf32>
    tpu.vector_store %arg4[%c0_12, %c0_13, %c0_14], %38 {strides = array<i32>} : memref<1x8x128xf32, #tpu.memory_space<vmem>>, vector<1x8x1xf32>,
    %c0_15 = arith.constant 0 : index
    %c0_16 = arith.constant 0 : index
    %c1_17 = arith.constant 1 : index
    %39 = vector.load %arg4[%c0_15, %c0_16, %c1_17] : memref<1x8x128xf32, #tpu.memory_space<vmem>>, vector<1x8x1xf32>
    %40 = vector.shape_cast %39 : vector<1x8x1xf32> to vector<8x1xf32>
    %41 = arith.mulf %30, %30 : vector<8x16xf32>
    %cst_18 = arith.constant dense<0.000000e+00> : vector<8xf32>
    %42 = vector.multi_reduction <add>, %41, %cst_18 [1] : vector<8x16xf32> to vector<8xf32>
    %43 = vector.shape_cast %42 : vector<8xf32> to vector<8x1xf32>
    %44 = arith.addf %40, %43 : vector<8x1xf32>
    %c0_19 = arith.constant 0 : index
    %c0_20 = arith.constant 0 : index
    %c1_21 = arith.constant 1 : index
    %45 = vector.load %arg4[%c0_19, %c0_20, %c1_21] : memref<1x8x128xf32, #tpu.memory_space<vmem>>, vector<1x8x1xf32>
    %46 = vector.shape_cast %45 : vector<1x8x1xf32> to vector<8x1xf32>
    %47 = vector.shape_cast %44 : vector<8x1xf32> to vector<1x8x1xf32>
    tpu.vector_store %arg4[%c0_19, %c0_20, %c1_21], %47 {strides = array<i32>} : memref<1x8x128xf32, #tpu.memory_space<vmem>>, vector<1x8x1xf32>,
    return
  }
  func.func @transform_0(%arg0: i32, %arg1: i32) -> (i32, i32) {
    %c0_i32 = arith.constant 0 : i32
    %c0_i32_0 = arith.constant 0 : i32
    %c0_i32_1 = arith.constant 0 : i32
    return %c0_i32, %c0_i32_0 : i32, i32
  }
  func.func @transform_1(%arg0: i32, %arg1: i32) -> (i32, i32, i32) {
    %c0_i32 = arith.constant 0 : i32
    %c0_i32_0 = arith.constant 0 : i32
    return %arg0, %c0_i32, %arg1 : i32, i32, i32
  }
  func.func @transform_2(%arg0: i32, %arg1: i32) -> (i32, i32, i32) {
    %c0_i32 = arith.constant 0 : i32
    %c0_i32_0 = arith.constant 0 : i32
    %c0_i32_1 = arith.constant 0 : i32
    return %arg0, %c0_i32, %c0_i32_0 : i32, i32, i32
  }
}

module attributes {stable_mosaic.version = 11 : i64} {
  func.func @_fsq_apply_kernel(%arg0: i32, %arg1: i32, %arg2: memref<8x11xf32, #tpu.memory_space<vmem>>, %arg3: memref<4x4xf32, #tpu.memory_space<vmem>>, %arg4: memref<1x4x16xf32, #tpu.memory_space<vmem>>, %arg5: memref<1x4x16xf32, #tpu.memory_space<vmem>>, %arg6: memref<1x8x40xf32, #tpu.memory_space<vmem>>, %arg7: memref<1x1xf32, #tpu.memory_space<vmem>>) attributes {dimension_semantics = [#tpu.dimension_semantics<parallel>, #tpu.dimension_semantics<arbitrary>], iteration_bounds = array<i64: 2, 1>, scalar_prefetch = 0 : i64, scratch_operands = 1 : i64, tpu.core_type = #tpu.core_type<tc>, window_params = [{pipeline_mode = #tpu.pipeline_mode<synchronous>, transform_indices = @transform_0, window_bounds = array<i64: 8, 11>}, {pipeline_mode = #tpu.pipeline_mode<synchronous>, transform_indices = @transform_1, window_bounds = array<i64: 4, 4>}, {transform_indices = @transform_2, window_bounds = array<i64: 1, 4, 16>}, {transform_indices = @transform_3, window_bounds = array<i64: 1, 4, 16>}, {transform_indices = @transform_4, window_bounds = array<i64: 1, 8, 40>}]} {
    %c0_i32 = arith.constant 0 : i32
    %0 = arith.cmpi eq, %arg1, %c0_i32 : i32
    %1 = arith.extui %0 : i1 to i32
    %c0_i32_0 = arith.constant 0 : i32
    %2 = arith.cmpi ne, %1, %c0_i32_0 : i32
    scf.if %2 {
      %cst_45 = arith.constant 0.000000e+00 : f32
      %110 = vector.broadcast %cst_45 : f32 to vector<1x8x40xf32>
      %c0_46 = arith.constant 0 : index
      %c0_47 = arith.constant 0 : index
      %c0_48 = arith.constant 0 : index
      %111 = vector.load %arg6[%c0_46, %c0_47, %c0_48] : memref<1x8x40xf32, #tpu.memory_space<vmem>>, vector<1x8x40xf32>
      tpu.vector_store %arg6[%c0_46, %c0_47, %c0_48], %110 {strides = array<i32>} : memref<1x8x40xf32, #tpu.memory_space<vmem>>, vector<1x8x40xf32>,
      %cst_49 = arith.constant 0.000000e+00 : f32
      %112 = vector.broadcast %cst_49 : f32 to vector<1x1xf32>
      %c0_50 = arith.constant 0 : index
      %c0_51 = arith.constant 0 : index
      %113 = vector.load %arg7[%c0_50, %c0_51] : memref<1x1xf32, #tpu.memory_space<vmem>>, vector<1x1xf32>
      tpu.vector_store %arg7[%c0_50, %c0_51], %112 {strides = array<i32>} : memref<1x1xf32, #tpu.memory_space<vmem>>, vector<1x1xf32>,
    } else {
    }
    %c0 = arith.constant 0 : index
    %c0_1 = arith.constant 0 : index
    %c0_2 = arith.constant 0 : index
    %3 = vector.load %arg4[%c0, %c0_1, %c0_2] : memref<1x4x16xf32, #tpu.memory_space<vmem>>, vector<1x4x16xf32>
    %4 = vector.shape_cast %3 : vector<1x4x16xf32> to vector<4x16xf32>
    %c0_3 = arith.constant 0 : index
    %c4 = arith.constant 4 : index
    %5 = vector.load %arg2[%c0_3, %c4] : memref<8x11xf32, #tpu.memory_space<vmem>>, vector<8x1xf32>
    %c0_4 = arith.constant 0 : index
    %c5 = arith.constant 5 : index
    %6 = vector.load %arg2[%c0_4, %c5] : memref<8x11xf32, #tpu.memory_space<vmem>>, vector<8x1xf32>
    %c0_5 = arith.constant 0 : index
    %c6 = arith.constant 6 : index
    %7 = vector.load %arg2[%c0_5, %c6] : memref<8x11xf32, #tpu.memory_space<vmem>>, vector<8x1xf32>
    %c0_6 = arith.constant 0 : index
    %c7 = arith.constant 7 : index
    %8 = vector.load %arg2[%c0_6, %c7] : memref<8x11xf32, #tpu.memory_space<vmem>>, vector<8x1xf32>
    %c0_7 = arith.constant 0 : index
    %c8 = arith.constant 8 : index
    %9 = vector.load %arg2[%c0_7, %c8] : memref<8x11xf32, #tpu.memory_space<vmem>>, vector<8x1xf32>
    %c0_8 = arith.constant 0 : index
    %c9 = arith.constant 9 : index
    %10 = vector.load %arg2[%c0_8, %c9] : memref<8x11xf32, #tpu.memory_space<vmem>>, vector<8x1xf32>
    %c0_9 = arith.constant 0 : index
    %c10 = arith.constant 10 : index
    %11 = vector.load %arg2[%c0_9, %c10] : memref<8x11xf32, #tpu.memory_space<vmem>>, vector<8x1xf32>
    %c0_10 = arith.constant 0 : index
    %c0_11 = arith.constant 0 : index
    %12 = vector.load %arg2[%c0_10, %c0_11] : memref<8x11xf32, #tpu.memory_space<vmem>>, vector<8x1xf32>
    %13 = vector.extract_strided_slice %4 {offsets = [0, 0], sizes = [1, 16], strides = [1, 1]} : vector<4x16xf32> to vector<1x16xf32>
    %14 = vector.broadcast %12 : vector<8x1xf32> to vector<8x16xf32>
    %15 = vector.broadcast %13 : vector<1x16xf32> to vector<8x16xf32>
    %16 = arith.mulf %14, %15 : vector<8x16xf32>
    %17 = vector.broadcast %5 : vector<8x1xf32> to vector<8x16xf32>
    %18 = arith.addf %17, %16 : vector<8x16xf32>
    %c0_12 = arith.constant 0 : index
    %c1 = arith.constant 1 : index
    %19 = vector.load %arg2[%c0_12, %c1] : memref<8x11xf32, #tpu.memory_space<vmem>>, vector<8x1xf32>
    %20 = vector.extract_strided_slice %4 {offsets = [1, 0], sizes = [1, 16], strides = [1, 1]} : vector<4x16xf32> to vector<1x16xf32>
    %21 = vector.broadcast %19 : vector<8x1xf32> to vector<8x16xf32>
    %22 = vector.broadcast %20 : vector<1x16xf32> to vector<8x16xf32>
    %23 = arith.mulf %21, %22 : vector<8x16xf32>
    %24 = arith.addf %18, %23 : vector<8x16xf32>
    %c0_13 = arith.constant 0 : index
    %c2 = arith.constant 2 : index
    %25 = vector.load %arg2[%c0_13, %c2] : memref<8x11xf32, #tpu.memory_space<vmem>>, vector<8x1xf32>
    %26 = vector.extract_strided_slice %4 {offsets = [2, 0], sizes = [1, 16], strides = [1, 1]} : vector<4x16xf32> to vector<1x16xf32>
    %27 = vector.broadcast %25 : vector<8x1xf32> to vector<8x16xf32>
    %28 = vector.broadcast %26 : vector<1x16xf32> to vector<8x16xf32>
    %29 = arith.mulf %27, %28 : vector<8x16xf32>
    %30 = arith.addf %24, %29 : vector<8x16xf32>
    %c0_14 = arith.constant 0 : index
    %c3 = arith.constant 3 : index
    %31 = vector.load %arg2[%c0_14, %c3] : memref<8x11xf32, #tpu.memory_space<vmem>>, vector<8x1xf32>
    %32 = vector.extract_strided_slice %4 {offsets = [3, 0], sizes = [1, 16], strides = [1, 1]} : vector<4x16xf32> to vector<1x16xf32>
    %33 = vector.broadcast %31 : vector<8x1xf32> to vector<8x16xf32>
    %34 = vector.broadcast %32 : vector<1x16xf32> to vector<8x16xf32>
    %35 = arith.mulf %33, %34 : vector<8x16xf32>
    %36 = arith.addf %30, %35 : vector<8x16xf32>
    %37 = vector.broadcast %8 : vector<8x1xf32> to vector<8x16xf32>
    %38 = arith.addf %36, %37 : vector<8x16xf32>
    %39 = math.tanh %38 : vector<8x16xf32>
    %40 = vector.broadcast %6 : vector<8x1xf32> to vector<8x16xf32>
    %41 = arith.mulf %39, %40 : vector<8x16xf32>
    %42 = vector.broadcast %7 : vector<8x1xf32> to vector<8x16xf32>
    %43 = arith.subf %41, %42 : vector<8x16xf32>
    %44 = math.roundeven %43 : vector<8x16xf32>
    %45 = vector.broadcast %9 : vector<8x1xf32> to vector<8x16xf32>
    %46 = arith.mulf %44, %45 : vector<8x16xf32>
    %47 = vector.broadcast %10 : vector<8x1xf32> to vector<8x16xf32>
    %48 = arith.addf %44, %47 : vector<8x16xf32>
    %49 = vector.broadcast %11 : vector<8x1xf32> to vector<8x16xf32>
    %50 = arith.mulf %48, %49 : vector<8x16xf32>
    %cst = arith.constant dense<0.000000e+00> : vector<16xf32>
    %51 = vector.multi_reduction <add>, %50, %cst [0] : vector<8x16xf32> to vector<16xf32>
    %52 = vector.shape_cast %51 : vector<16xf32> to vector<1x16xf32>
    %53 = arith.fptosi %52 : vector<1x16xf32> to vector<1x16xi32>
    %54 = vector.extract_strided_slice %48 {offsets = [2, 0], sizes = [1, 16], strides = [1, 1]} : vector<8x16xf32> to vector<1x16xf32>
    %55 = arith.fptosi %54 : vector<1x16xf32> to vector<1x16xi32>
    %56 = tpu.iota {dimensions = array<i32: 0>} : vector<40x16xi32>
    %57 = vector.broadcast %53 : vector<1x16xi32> to vector<40x16xi32>
    %58 = arith.cmpi eq, %56, %57 : vector<40x16xi32>
    %cst_15 = arith.constant 1.000000e+00 : f32
    %cst_16 = arith.constant 0.000000e+00 : f32
    %59 = vector.broadcast %cst_15 : f32 to vector<40x16xf32>
    %60 = vector.broadcast %cst_16 : f32 to vector<40x16xf32>
    %61 = arith.select %58, %59, %60 : vector<40x16xi1>, vector<40x16xf32>
    %62 = tpu.iota {dimensions = array<i32: 0>} : vector<8x16xi32>
    %63 = vector.broadcast %55 : vector<1x16xi32> to vector<8x16xi32>
    %64 = arith.cmpi eq, %62, %63 : vector<8x16xi32>
    %cst_17 = arith.constant 1.000000e+00 : f32
    %cst_18 = arith.constant 0.000000e+00 : f32
    %65 = vector.broadcast %cst_17 : f32 to vector<8x16xf32>
    %66 = vector.broadcast %cst_18 : f32 to vector<8x16xf32>
    %67 = arith.select %64, %65, %66 : vector<8x16xi1>, vector<8x16xf32>
    %cst_19 = arith.constant dense<0.000000e+00> : vector<8x40xf32>
    %68 = tpu.matmul %67, %61, %cst_19 {dimension_numbers = #tpu.dot_dimension_numbers<[1], [1], [0], [0], [0, 0, 1, 0], [], []>} : vector<8x16xf32>, vector<40x16xf32>, vector<8x40xf32> -> vector<8x40xf32>
    %c0_20 = arith.constant 0 : index
    %c0_21 = arith.constant 0 : index
    %c0_22 = arith.constant 0 : index
    %69 = vector.load %arg6[%c0_20, %c0_21, %c0_22] : memref<1x8x40xf32, #tpu.memory_space<vmem>>, vector<1x8x40xf32>
    %70 = vector.shape_cast %69 : vector<1x8x40xf32> to vector<8x40xf32>
    %71 = arith.addf %70, %68 : vector<8x40xf32>
    %c0_23 = arith.constant 0 : index
    %c0_24 = arith.constant 0 : index
    %c0_25 = arith.constant 0 : index
    %72 = vector.load %arg6[%c0_23, %c0_24, %c0_25] : memref<1x8x40xf32, #tpu.memory_space<vmem>>, vector<1x8x40xf32>
    %73 = vector.shape_cast %72 : vector<1x8x40xf32> to vector<8x40xf32>
    %74 = vector.shape_cast %71 : vector<8x40xf32> to vector<1x8x40xf32>
    tpu.vector_store %arg6[%c0_23, %c0_24, %c0_25], %74 {strides = array<i32>} : memref<1x8x40xf32, #tpu.memory_space<vmem>>, vector<1x8x40xf32>,
    %c0_26 = arith.constant 0 : index
    %c3_27 = arith.constant 3 : index
    %75 = vector.load %arg3[%c0_26, %c3_27] : memref<4x4xf32, #tpu.memory_space<vmem>>, vector<4x1xf32>
    %c0_28 = arith.constant 0 : index
    %c0_29 = arith.constant 0 : index
    %76 = vector.load %arg3[%c0_28, %c0_29] : memref<4x4xf32, #tpu.memory_space<vmem>>, vector<4x1xf32>
    %77 = vector.extract_strided_slice %46 {offsets = [0, 0], sizes = [1, 16], strides = [1, 1]} : vector<8x16xf32> to vector<1x16xf32>
    %78 = vector.broadcast %76 : vector<4x1xf32> to vector<4x16xf32>
    %79 = vector.broadcast %77 : vector<1x16xf32> to vector<4x16xf32>
    %80 = arith.mulf %78, %79 : vector<4x16xf32>
    %81 = vector.broadcast %75 : vector<4x1xf32> to vector<4x16xf32>
    %82 = arith.addf %81, %80 : vector<4x16xf32>
    %c0_30 = arith.constant 0 : index
    %c1_31 = arith.constant 1 : index
    %83 = vector.load %arg3[%c0_30, %c1_31] : memref<4x4xf32, #tpu.memory_space<vmem>>, vector<4x1xf32>
    %84 = vector.extract_strided_slice %46 {offsets = [1, 0], sizes = [1, 16], strides = [1, 1]} : vector<8x16xf32> to vector<1x16xf32>
    %85 = vector.broadcast %83 : vector<4x1xf32> to vector<4x16xf32>
    %86 = vector.broadcast %84 : vector<1x16xf32> to vector<4x16xf32>
    %87 = arith.mulf %85, %86 : vector<4x16xf32>
    %88 = arith.addf %82, %87 : vector<4x16xf32>
    %c0_32 = arith.constant 0 : index
    %c2_33 = arith.constant 2 : index
    %89 = vector.load %arg3[%c0_32, %c2_33] : memref<4x4xf32, #tpu.memory_space<vmem>>, vector<4x1xf32>
    %90 = vector.extract_strided_slice %46 {offsets = [2, 0], sizes = [1, 16], strides = [1, 1]} : vector<8x16xf32> to vector<1x16xf32>
    %91 = vector.broadcast %89 : vector<4x1xf32> to vector<4x16xf32>
    %92 = vector.broadcast %90 : vector<1x16xf32> to vector<4x16xf32>
    %93 = arith.mulf %91, %92 : vector<4x16xf32>
    %94 = arith.addf %88, %93 : vector<4x16xf32>
    %c0_34 = arith.constant 0 : index
    %c0_35 = arith.constant 0 : index
    %c0_36 = arith.constant 0 : index
    %95 = vector.load %arg5[%c0_34, %c0_35, %c0_36] : memref<1x4x16xf32, #tpu.memory_space<vmem>>, vector<1x4x16xf32>
    %96 = vector.shape_cast %95 : vector<1x4x16xf32> to vector<4x16xf32>
    %97 = vector.shape_cast %94 : vector<4x16xf32> to vector<1x4x16xf32>
    tpu.vector_store %arg5[%c0_34, %c0_35, %c0_36], %97 {strides = array<i32>} : memref<1x4x16xf32, #tpu.memory_space<vmem>>, vector<1x4x16xf32>,
    %98 = arith.subf %4, %94 : vector<4x16xf32>
    %c0_37 = arith.constant 0 : index
    %c0_38 = arith.constant 0 : index
    %99 = vector.load %arg7[%c0_37, %c0_38] : memref<1x1xf32, #tpu.memory_space<vmem>>, vector<1x1xf32>
    %100 = arith.mulf %98, %98 : vector<4x16xf32>
    %cst_39 = arith.constant dense<0.000000e+00> : vector<16xf32>
    %101 = vector.multi_reduction <add>, %100, %cst_39 [0] : vector<4x16xf32> to vector<16xf32>
    %102 = vector.shape_cast %101 : vector<16xf32> to vector<1x16xf32>
    %cst_40 = arith.constant dense<0.000000e+00> : vector<1xf32>
    %103 = vector.multi_reduction <add>, %102, %cst_40 [1] : vector<1x16xf32> to vector<1xf32>
    %104 = vector.shape_cast %103 : vector<1xf32> to vector<1x1xf32>
    %105 = arith.addf %99, %104 : vector<1x1xf32>
    %c0_41 = arith.constant 0 : index
    %c0_42 = arith.constant 0 : index
    %106 = vector.load %arg7[%c0_41, %c0_42] : memref<1x1xf32, #tpu.memory_space<vmem>>, vector<1x1xf32>
    tpu.vector_store %arg7[%c0_41, %c0_42], %105 {strides = array<i32>} : memref<1x1xf32, #tpu.memory_space<vmem>>, vector<1x1xf32>,
    %c0_i32_43 = arith.constant 0 : i32
    %107 = arith.cmpi eq, %arg1, %c0_i32_43 : i32
    %108 = arith.extui %107 : i1 to i32
    %c0_i32_44 = arith.constant 0 : i32
    %109 = arith.cmpi ne, %108, %c0_i32_44 : i32
    scf.if %109 {
      %c0_45 = arith.constant 0 : index
      %c0_46 = arith.constant 0 : index
      %110 = vector.load %arg7[%c0_45, %c0_46] : memref<1x1xf32, #tpu.memory_space<vmem>>, vector<1x1xf32>
      %c0_47 = arith.constant 0 : index
      %c7_48 = arith.constant 7 : index
      %c0_49 = arith.constant 0 : index
      %111 = vector.load %arg6[%c0_47, %c7_48, %c0_49] : memref<1x8x40xf32, #tpu.memory_space<vmem>>, vector<1x1x1xf32>
      %112 = vector.shape_cast %111 : vector<1x1x1xf32> to vector<1x1xf32>
      %113 = vector.shape_cast %110 : vector<1x1xf32> to vector<1x1x1xf32>
      tpu.vector_store %arg6[%c0_47, %c7_48, %c0_49], %113 {strides = array<i32>} : memref<1x8x40xf32, #tpu.memory_space<vmem>>, vector<1x1x1xf32>,
    } else {
    }
    return
  }
  func.func @transform_0(%arg0: i32, %arg1: i32) -> (i32, i32) {
    %c0_i32 = arith.constant 0 : i32
    %c0_i32_0 = arith.constant 0 : i32
    %c0_i32_1 = arith.constant 0 : i32
    return %c0_i32, %c0_i32_0 : i32, i32
  }
  func.func @transform_1(%arg0: i32, %arg1: i32) -> (i32, i32) {
    %c0_i32 = arith.constant 0 : i32
    %c0_i32_0 = arith.constant 0 : i32
    %c0_i32_1 = arith.constant 0 : i32
    return %c0_i32, %c0_i32_0 : i32, i32
  }
  func.func @transform_2(%arg0: i32, %arg1: i32) -> (i32, i32, i32) {
    %c0_i32 = arith.constant 0 : i32
    %c0_i32_0 = arith.constant 0 : i32
    return %arg0, %c0_i32, %arg1 : i32, i32, i32
  }
  func.func @transform_3(%arg0: i32, %arg1: i32) -> (i32, i32, i32) {
    %c0_i32 = arith.constant 0 : i32
    %c0_i32_0 = arith.constant 0 : i32
    return %arg0, %c0_i32, %arg1 : i32, i32, i32
  }
  func.func @transform_4(%arg0: i32, %arg1: i32) -> (i32, i32, i32) {
    %c0_i32 = arith.constant 0 : i32
    %c0_i32_0 = arith.constant 0 : i32
    %c0_i32_1 = arith.constant 0 : i32
    return %arg0, %c0_i32, %c0_i32_0 : i32, i32, i32
  }
}

</mosaic_0001>

<bundles_post_ra>
// kernel: _lambda_.2
= control target key start
LH: loop header
LB: loop body
LE: loop exit
PB: predicated region body
PF: predicated region fallthrough
CT: control target
= control target key end

     0   :  { %s384_s9 = smov 0   ;;  %s386_s10 = smov 0   ;;  %s426_s0 = inlined_call_operand.vmem [shape: f32[8,5], index: 0, kind: input, shape index: {}]   ;;  %s427_s1 = inlined_call_operand.vmem [shape: f32[2,4,16], index: 1, kind: input, shape index: {}]   ;;  %s428_s2 = inlined_call_operand.vmem [shape: f32[2,8,128], index: 2, kind: output, shape index: {}]  }
   0x1   :  { %s388_s11 = smov 0  }
   0x2 LB: > { %s24_s12 = sadd.s32 1, %s357_s10  ;;  %p298_p0 = scmp.ge.s32.totalorder %s361_s11, 1  ;;  %s361_s11 = sphi %s388_s11, %s12_s11   ;;  %s357_s10 = sphi %s386_s10, %s430_s10   ;;  %s353_s9 = sphi %s384_s9, %s429_s9  }
   0x3   : > { %p26_p1 = scmp.ge.s32.totalorder %s24_s12, 2  ;;  %p128_p2 = scmp.lt.s32.totalorder %s361_s11, 3 }
   0x5   : > { %s432_s12 = smov (%p26_p1, %s24_s12), 0  ;;  %p129_p3 = pnand %p298_p0, %p128_p2 }
   0x6   : > { %v168_v0 = vld [vmem:[%s426_s0] sm:$0xff] (!%p129_p3)  ;;  %v363_v1 = vmov (!%p129_p3), 1   ;;  %v364_v2 = vmov (!%p129_p3), 0   ;;  %v365_v3 = vmov (!%p129_p3), 2   ;;  %v366_v4 = vmov (!%p129_p3), 4   ;;  %p151_p4 = scmp.lt.s32.totalorder (!%p129_p3), %s353_s9, 1 }
   0x7   : > { %132 = sbr.rel (%p129_p3) target bundleno = 304 (0x130), region = 28  ;;  %335 = vset.pattern.permute.xlu1 (!%p129_p3), %v363_v1  ;;  %333 = vset.pattern.permute.xlu0 (!%p129_p3), %v364_v2  ;;  %v367_v5 = vmov (!%p129_p3), 3   ;;  %v368_v6 = vmov (!%p129_p3), 0.0   ;;  %v174_v7 = vlaneseq (!%p129_p3)  ;;  %vm215_vm0 = vcmask (!%p129_p3), 130048  }
   0x8   : > { %185 = vperm.xlu1 (!%p129_p3), %335, %v168_v0   ;;  %171 = vperm.xlu0 (!%p129_p3), %333, %v168_v0   ;;  %vm220_vm1 = vcmask (!%p129_p3), 7168   ;;  %vm228_vm2 = vcmask (!%p129_p3), 15368  }
   0x9   : > { %v175_v8 = vshrl.u32 (!%p129_p3), %v174_v7, 7 }
   0xb   : > { %v176_v9 = vsub.s32 (!%p129_p3), 0, %v175_v8  ;;  %v190_v11 = vsub.s32 (!%p129_p3), 1, %v175_v8  ;;  %v200_v15 = vsub.s32 (!%p129_p3), 2, %v175_v8  ;;  %v210_v17 = vsub.s32 (!%p129_p3), 3, %v175_v8 }
   0xc   : > { %336 = vset.pattern.permute.xlu1 (!%p129_p3), %v365_v3  ;;  %334 = vset.pattern.permute.xlu0 (!%p129_p3), %v366_v4 }
   0xd   : > { %195 = vperm.xlu1 (!%p129_p3), %336, %v168_v0   ;;  %180 = vperm.xlu0 (!%p129_p3), %334, %v168_v0  }
   0xe   : > { %s434_s9 = smov (!%p151_p4, %s353_s9), 1 }
   0xf   : > { %s300_s15 = sshll.u32 %s434_s9, 3  ;;  %s299_s19 = sshll.u32 %s434_s9, 2 }
  0x10   : > { %s408_s18 = scalar_lea.vmem %s428_s2, %s300_s15  ;;  %s157_s22 = scalar_lea.vmem %s427_s1, %s299_s19 }
  0x11   : > { %337 = vset.pattern.permute.xlu1 %v367_v5  ;;  %338 = vset.pattern.permute.xlu0 %v367_v5  ;;  %166 = vst [vmem:[%s408_s18] sm:$0xff] %v368_v6  ;;  %v167_v10 = vld [vmem:[%s157_s22] sm:$0xf] }
  0x12   : > { %205 = vperm.xlu1 %337, %v168_v0   ;;  %v177_v14 = vrot.slane %v167_v10, %v176_v9  ;;  %v191_v16 = vrot.slane %v167_v10, %v190_v11  ;;  %v201_v19 = vrot.slane %v167_v10, %v200_v15  ;;  %v211_v24 = vrot.slane %v167_v10, %v210_v17 }
  0x87   : > { %v186_v12 = vpop.permute.xlu1 %185  ;;  %v172_v13 = vpop.permute.xlu0 %171 }
  0x88   : > { %v178_v18 = vmul.f32 %v177_v14, %v172_v13  ;;  %v192_v22 = vmul.f32 %v191_v16, %v186_v12 }
  0x8c   : > { %v196_v20 = vpop.permute.xlu1 %195  ;;  %v181_v21 = vpop.permute.xlu0 %180 }
  0x8d   : > { %v183_v23 = vadd.f32 %v181_v21, %v178_v18  ;;  %v202_v25 = vmul.f32 %v201_v19, %v196_v20 }
  0x8f   : > { %v193_v26 = vadd.f32 %v192_v22, %v183_v23 }
  0x91   : > { %v206_v27 = vpop.permute.xlu1 %205  ;;  %v203_v28 = vadd.f32 %v202_v25, %v193_v26 }
  0x92   : > { %v212_v29 = vmul.f32 %v211_v24, %v206_v27 }
  0x94   : > { %v213_v30 = vadd.f32 %v212_v29, %v203_v28 }
  0x96   : > { %v216_v31 = vsel %vm215_vm0, %v213_v30, 0.0  ;;  %v223_v32 = vmul.f32 %v213_v30, %v213_v30 }
  0x97   : > { %217 = vadd.xlane.f32.xlu0 %v216_v31 }
  0x98   : > { %v224_v33 = vsel %vm215_vm0, %v223_v32, 0.0 }
  0x99   : > { %225 = vadd.xlane.f32.xlu1 %v224_v33 }
 0x124   : > { %v218_v34 = vpop.xlane.xlu0 %217 }
 0x125   : > { %221 = vst.msk [vmem:[%s408_s18] sm:$0xff] %vm220_vm1, %v218_v34 }
 0x126   : > { %v226_v35 = vpop.xlane.xlu1 %225 }
 0x12c   : > { %v222_v36 = vld [vmem:[%s408_s18] sm:$0xff] }
 0x12d   : > { %v227_v37 = vadd.f32 %v226_v35, %v222_v36 }
 0x12f   : > { %229 = vst.msk [vmem:[%s408_s18] sm:$0xff] %vm228_vm2, %v227_v37 }
 0x130 PF: > { %s12_s11 = sadd.s32 1, %s361_s11   ;;  %s429_s9 = smov %s357_s10 }
 0x131   : > { %p9_p5 = scmp.ge.s32.totalorder %s12_s11, 4   ;;  %s430_s10 = smov %s432_s12 }
 0x133   :  { %11 = sbr.rel (!%p9_p5) target bundleno = 2 (0x2), region = 62 }

// kernel: _lambda_.3
= control target key start
LH: loop header
LB: loop body
LE: loop exit
PB: predicated region body
PF: predicated region fallthrough
CT: control target
= control target key end

     0   :  { %10 = vsyncpa [#allocation4], 0  ;;  %s1056_s0 = inlined_call_operand.vmem [shape: f32[8,11], index: 0, kind: input, shape index: {}]   ;;  %s1057_s1 = inlined_call_operand.vmem [shape: f32[4,4], index: 1, kind: input, shape index: {}]   ;;  %s1058_s2 = inlined_call_operand.vmem [shape: f32[2,4,16], index: 2, kind: input, shape index: {}]   ;;  %s1059_s3 = inlined_call_operand.hbm [shape: f32[2,4,16], index: 3, kind: output, shape index: {0}]   ;;  %s1060_s4 = inlined_call_operand.vmem [shape: f32[2,8,40], index: 4, kind: output, shape index: {1}]  }
   0x1   :  { %12 = vsyncpa [#allocation4 + $0x1], 0  ;;  %s872_s15 = smov 0   ;;  %s874_s16 = smov 0  }
   0x2   :  { %s876_s17 = smov 0   ;;  %s878_s18 = smov 0  }
   0x3   :  { %s880_s19 = smov 0   ;;  %s882_s20 = smov 0  }
   0x4 LB: > { %s616_s21 = sadd.s32 4294967295, %s830_s20   ;;  %s617_s22 = sadd.s32 4294967294, %s830_s20   ;;  %s830_s20 = sphi %s882_s20, %s18_s20   ;;  %s826_s19 = sphi %s880_s19, %s1069_s19   ;;  %s822_s18 = sphi %s878_s18, %s1068_s18   ;;  %s818_s17 = sphi %s876_s17, %s1067_s17   ;;  %s814_s16 = sphi %s874_s16, %s1066_s16   ;;  %s810_s15 = sphi %s872_s15, %s1065_s15  }
   0x5   : > { %s30_s23 = sadd.s32 1, %s826_s19  ;;  %s109_s24 = sadd.s32 1, %s818_s17 }
   0x6   : > { %p32_p0 = scmp.ge.s32.totalorder %s30_s23, 2  ;;  %p119_p1 = scmp.ne.s32.totalorder %s818_s17, %s814_s16 }
   0x7   : > { %p120_p2 = scmp.eq.s32.totalorder %s616_s21, 1  ;;  %p125_p3 = scmp.ne.s32.totalorder %s814_s16, %s810_s15 }
   0x8   : > { %s1071_s23 = smov (%p32_p0, %s30_s23), 0  ;;  %p126_p5 = scmp.eq.s32.totalorder %s617_s22, 1 }
   0x9   : > { %p912_p4 = por %p120_p2, %p119_p1  ;;  %s104_s26 = ssub.s32 %s826_s19, %s1071_s23 }
   0xa   : > { %p620_p6 = scmp.ge.s32.totalorder %s830_s20, 1  ;;  %p107_p7 = scmp.eq.s32.totalorder %s104_s26, 0 }
   0xb   : > { %p919_p8 = por %p126_p5, %p125_p3  ;;  %p186_p9 = scmp.lt.s32.totalorder %s830_s20, 3 }
   0xc   : > { %s925_s28 = scalar_select %p107_p7, %s818_s17, %s109_s24  }
   0xd   : > { %p187_p10 = pnand %p620_p6, %p186_p9 }
   0xe   : > { %v238_v0 = vld [vmem:[%s1056_s0] sm:$0xff] (!%p187_p10)  ;;  %v832_v1 = vmov (!%p187_p10), 1   ;;  %v833_v2 = vmov (!%p187_p10), 0   ;;  %v834_v3 = vmov (!%p187_p10), 2   ;;  %v835_v4 = vmov (!%p187_p10), 4   ;;  %p218_p11 = scmp.lt.s32.totalorder (!%p187_p10), %s822_s18, 1 }
   0xf   : > { %190 = sbr.rel (%p187_p10) target bundleno = 437 (0x1b5), region = 32  ;;  %737 = vset.pattern.permute.xlu1 (!%p187_p10), %v832_v1  ;;  %735 = vset.pattern.permute.xlu0 (!%p187_p10), %v833_v2  ;;  %v836_v5 = vmov (!%p187_p10), 3   ;;  %v837_v6 = vmov (!%p187_p10), 7   ;;  %v838_v7 = vmov (!%p187_p10), 5   ;;  %v839_v8 = vmov (!%p187_p10), 9   ;;  %s209_s12 = sand.u32 (!%p187_p10), 1, %s814_s16  }
  0x10   : > { %255 = vperm.xlu1 (!%p187_p10), %737, %v238_v0   ;;  %241 = vperm.xlu0 (!%p187_p10), %735, %v238_v0   ;;  %v440_v9 = vld [vmem:[%s1057_s1] sm:$0xf] (!%p187_p10)  ;;  %v840_v10 = vmov (!%p187_p10), 6   ;;  %v841_v11 = vmov (!%p187_p10), 10   ;;  %v842_v12 = vmov (!%p187_p10), 8   ;;  %v843_v13 = vmov (!%p187_p10), 0.0|0.0  }
  0x11   : > { %653 = vmatprep.subr.bf16.mxu0 (!%p187_p10), %v843_v13  ;;  %vm844_vm0 = vmmov (!%p187_p10), 0   ;;  %v845_v14 = vmov (!%p187_p10), 0.0   ;;  %vm235_vm1 = vcmask (!%p187_p10), 0   ;;  %v244_v15 = vlaneseq (!%p187_p10)  ;;  %s959_s13 = sshll.u32 (!%p187_p10), %s209_s12, 2  ;;  %s631_s29 = sshll.u32 (!%p187_p10), %s822_s18, 6 }
  0x12   : > { %650 = vmatprep.mubr.msk.f32.mxu0 (!%p187_p10), %vm844_vm0, %v845_v14  ;;  %236 = vst.msk [vmem:[#allocation2] sm:$0x1] (!%p187_p10), %vm235_vm1, %v845_v14  ;;  %vm316_vm2 = vcmask (!%p187_p10), 130048   ;;  %vm476_vm3 = vcmask (!%p187_p10), 125952   ;;  %s211_s14 = scalar_lea.vmem (!%p187_p10), [#allocation3], %s959_s13  ;;  %vm233_vm11 = vcmask (!%p187_p10), 326656   ;;  %s1005_s6 = scalar_lea.hbm (!%p187_p10), %s1059_s3, %s631_s29 }
  0x13   : > { %v942_v16 = vshrl.u32 (!%p187_p10), %v244_v15, 7  ;;  %vm972_vm6 = vmpackc.low (!%p187_p10), %vm316_vm2, %vm316_vm2  ;;  %s846_s10 = smov (!%p187_p10), [#allocation3]  }
  0x14   : > { %738 = vset.pattern.permute.xlu1 (!%p187_p10), %v834_v3  ;;  %736 = vset.pattern.permute.xlu0 (!%p187_p10), %v835_v4 }
  0x15   : > { %265 = vperm.xlu1 (!%p187_p10), %738, %v238_v0   ;;  %250 = vperm.xlu0 (!%p187_p10), %736, %v238_v0   ;;  %v246_v17 = vsub.s32 (!%p187_p10), 0, %v942_v16  ;;  %v260_v19 = vsub.s32 (!%p187_p10), 1, %v942_v16  ;;  %v950_v23 = vsub.s32 (!%p187_p10), 2, %v942_v16  ;;  %v280_v25 = vsub.s32 (!%p187_p10), 3, %v942_v16 }
  0x16   : > { %s939_s7 = scalar_select %p218_p11, %s822_s18, 1 }
  0x18   : > { %s622_s8 = sshll.u32 %s939_s7, 2  ;;  %s623_s21 = sshll.u32 %s939_s7, 3 }
  0x19   : > { %739 = vset.pattern.permute.xlu1 %v836_v5  ;;  %740 = vset.pattern.permute.xlu0 %v837_v6  ;;  %s224_s11 = scalar_lea.vmem %s1058_s2, %s622_s8  ;;  %s996_s26 = scalar_lea.vmem %s1060_s4, %s623_s21 }
  0x1a   : > { %275 = vperm.xlu1 %739, %v238_v0   ;;  %285 = vperm.xlu0 %740, %v238_v0   ;;  %v237_v18 = vld [vmem:[%s224_s11] sm:$0xf]  ;;  %234 = vst.msk [vmem:[%s996_s26] sm:$0xff] %vm233_vm11, %v845_v14  ;;  %s518_s8 = sshll.u32 %s211_s14, 4  ;;  %s500_s7 = scalar_lea.sflag [#allocation4], %s209_s12  ;;  %s519_s8 = int_to_ptr.vmem [resolvable:$true] %s518_s8 }
  0x1b   : > { %v247_v22 = vrot.slane %v237_v18, %v246_v17  ;;  %v261_v24 = vrot.slane %v237_v18, %v260_v19  ;;  %v271_v27 = vrot.slane %v237_v18, %v950_v23  ;;  %v281_v32 = vrot.slane %v237_v18, %v280_v25  ;;  %s752_s9 = scalar_lea.vmem %s519_s8, 64  ;;  %s756_s11 = sshll.u32 %s846_s10, 4  ;;  %s757_s11 = int_to_ptr.vmem [resolvable:$false] %s756_s11 }
  0x1c   : > { %p753_p12 = scmp.ne.s32.totalorder %s519_s8, %s752_s9  ;;  %s758_s21 = scalar_lea.vmem %s757_s11, 128 }
  0x1d   : > { %p759_p1 = scmp.lt.s32.totalorder %s519_s8, %s757_s11  ;;  %p760_p2 = scmp.lt.s32.totalorder %s758_s21, %s752_s9 }
  0x1e   : > { %741 = vset.pattern.permute.xlu1 %v838_v7  ;;  %743 = vset.pattern.permute.xlu0 %v839_v8  ;;  %p754_p13 = pnand %p753_p12, %p912_p4 }
  0x1f   : > { %291 = vperm.xlu1 %741, %v238_v0   ;;  %307 = vperm.xlu0 %743, %v238_v0   ;;  %p761_p3 = por %p760_p2, %p759_p1 }
  0x20   : > { %p755_p0 = pneg %p754_p13 }
  0x22   : > { %p762_p5 = pnand %p761_p3, %p755_p0 }
  0x23   : > { %742 = vset.pattern.permute.xlu1 %v840_v10  ;;  %746 = vset.pattern.permute.xlu0 %v833_v2 }
  0x24   : > { %296 = vperm.xlu1 %742, %v238_v0   ;;  %443 = vperm.xlu0 %746, %v440_v9  }
  0x28   : > { %744 = vset.pattern.permute.xlu1 %v841_v11  ;;  %749 = vset.pattern.permute.xlu0 %v834_v3 }
  0x29   : > { %312 = vperm.xlu1 %744, %v238_v0   ;;  %467 = vperm.xlu0 %749, %v440_v9  }
  0x2d   : > { %745 = vset.pattern.permute.xlu1 %v842_v12  ;;  %v328_v12 = vadd.s32 8, %v942_v16 }
  0x2e   : > { %302 = vperm.xlu1 %745, %v238_v0  }
  0x32   : > { %747 = vset.pattern.permute.xlu1 %v836_v5 }
  0x33   : > { %452 = vperm.xlu1 %747, %v440_v9  }
  0x37   : > { %748 = vset.pattern.permute.xlu1 %v832_v1 }
  0x38   : > { %457 = vperm.xlu1 %748, %v440_v9  }
  0x8f   : > { %v256_v20 = vpop.permute.xlu1 %255  ;;  %v242_v21 = vpop.permute.xlu0 %241 }
  0x90   : > { %v248_v26 = vmul.f32 %v247_v22, %v242_v21  ;;  %v262_v30 = vmul.f32 %v261_v24, %v256_v20  ;;  %v329_v21 = vadd.s32 16, %v942_v16  ;;  %v330_v22 = vadd.s32 24, %v942_v16 }
  0x94   : > { %v266_v28 = vpop.permute.xlu1 %265  ;;  %v251_v29 = vpop.permute.xlu0 %250 }
  0x95   : > { %v253_v31 = vadd.f32 %v251_v29, %v248_v26  ;;  %v272_v33 = vmul.f32 %v271_v27, %v266_v28 }
  0x97   : > { %v263_v34 = vadd.f32 %v262_v30, %v253_v31 }
  0x99   : > { %v276_v35 = vpop.permute.xlu1 %275  ;;  %v273_v36 = vadd.f32 %v272_v33, %v263_v34  ;;  %v286_v38 = vpop.permute.xlu0 %285 }
  0x9a   : > { %v282_v37 = vmul.f32 %v281_v32, %v276_v35 }
  0x9c   : > { %v283_v39 = vadd.f32 %v282_v37, %v273_v36  ;;  %v331_v37 = vadd.s32 32, %v942_v16 }
  0x9e   : > { %v288_v40 = vadd.f32 %v286_v38, %v283_v39  ;;  %v292_v41 = vpop.permute.xlu1 %291  ;;  %v308_v46 = vpop.permute.xlu0 %307 }
  0xa0   : > { %750 = vtanh.f32 %v288_v40 }
  0xa3   : > { %v297_v42 = vpop.permute.xlu1 %296  ;;  %v444_v52 = vpop.permute.xlu0 %443 }
  0xa8   : > { %v313_v43 = vpop.permute.xlu1 %312  ;;  %v468_v62 = vpop.permute.xlu0 %467 }
  0xaa   : > { %v751_v44 = vpop.eup %750 }
  0xab   : > { %v294_v45 = vmul.f32 %v751_v44, %v292_v41 }
  0xad   : > { %v299_v47 = vsub.f32 %v294_v45, %v297_v42  ;;  %v303_v48 = vpop.permute.xlu1 %302 }
  0xaf   : > { %v661_v49 = vround.rtne.f32 %v299_v47 }
  0xb1   : > { %v310_v50 = vadd.f32 %v661_v49, %v308_v46  ;;  %v305_v51 = vmul.f32 %v661_v49, %v303_v48 }
  0xb2   : > { %v453_v53 = vpop.permute.xlu1 %452 }
  0xb3   : > { %v315_v54 = vmul.f32 %v313_v43, %v310_v50  ;;  %v449_v55 = vrot.slane %v305_v51, %v246_v17  ;;  %v473_v59 = vrot.slane %v305_v51, %v950_v23  ;;  %v463_v60 = vrot.slane %v305_v51, %v260_v19 }
  0xb4   : > { %v664_v30 = vtrunc.f32 %v310_v50 }
  0xb5   : > { %v317_v56 = vsel %vm316_vm2, %v315_v54, 0.0  ;;  %v450_v57 = vmul.f32 %v449_v55, %v444_v52  ;;  %v474_v3 = vmul.f32 %v473_v59, %v468_v62 }
  0xb6   : > { %v318_v58 = vrot.slane %v317_v56, 4  ;;  %v665_v36 = vcvt.f32.s32 %v664_v30 }
  0xb7   : > { %v455_v61 = vadd.f32 %v453_v53, %v450_v57  ;;  %v458_v63 = vpop.permute.xlu1 %457 }
  0xb8   : > { %v319_v0 = vadd.f32 %v318_v58, %v317_v56  ;;  %v464_v1 = vmul.f32 %v463_v60, %v458_v63 }
  0xba   : > { %v320_v2 = vrot.slane %v319_v0, 2  ;;  %v465_v4 = vadd.f32 %v464_v1, %v455_v61 }
  0xbc   : > { %v321_v5 = vadd.f32 %v320_v2, %v319_v0  ;;  %v475_v6 = vadd.f32 %v474_v3, %v465_v4 }
  0xbe   : > { %v322_v7 = vrot.slane %v321_v5, 1  ;;  %v478_v8 = vsub.f32 %v237_v18, %v475_v6  ;;  %477 = vst.msk [vmem:[%s211_s14] sm:$0xf] %vm476_vm3, %v475_v6 }
  0xc0   : > { %v323_v9 = vadd.f32 %v322_v7, %v321_v5  ;;  %v480_v10 = vmul.f32 %v478_v8, %v478_v8 }
  0xc2   : > { %v662_v11 = vtrunc.f32 %v323_v9  ;;  %v481_v15 = vsel %vm476_vm3, %v480_v10, 0.0 }
  0xc3   : > { %v482_v17 = vrot.slane %v481_v15, 4 }
  0xc4   : > { %v663_v19 = vcvt.f32.s32 %v662_v11 }
  0xc5   : > { %v483_v20 = vadd.f32 %v482_v17, %v481_v15 }
  0xc6   : > { %vm332_vm4 = vcmp.eq.s32.totalorder %v942_v16, %v663_v19  ;;  %vm333_vm5 = vcmp.eq.s32.totalorder %v328_v12, %v663_v19  ;;  %vm334_vm7 = vcmp.eq.s32.totalorder %v329_v21, %v663_v19  ;;  %vm335_vm8 = vcmp.eq.s32.totalorder %v330_v22, %v663_v19 }
  0xc7   : > { %v337_v18 = vsel %vm332_vm4, 1.0, %v845_v14  ;;  %v338_v24 = vsel %vm333_vm5, 1.0, %v845_v14  ;;  %v484_v26 = vrot.slane %v483_v20, 2  ;;  %v339_v32 = vsel %vm334_vm7, 1.0, %v845_v14 }
  0xc8   : > { %v654_v27 = vpack.c.bf16 %v338_v24, %v337_v18  ;;  %v340_v33 = vsel %vm335_vm8, 1.0, %v845_v14  ;;  %vm336_vm9 = vcmp.eq.s32.totalorder %v331_v37, %v663_v19 }
  0xc9   : > { %v485_v28 = vadd.f32 %v484_v26, %v483_v20  ;;  %v658_v35 = vpack.c.bf16 %v340_v33, %v339_v32  ;;  %v341_v38 = vsel %vm336_vm9, 1.0, %v845_v14 }
  0xca   : > { %656 = vmatpush3.bf16.xpose.msk.msra.mxu0 %vm972_vm6, %v654_v27 }
  0xcb   : > { %v486_v29 = vrot.slane %v485_v28, 1  ;;  %657 = vmatprep.subr.bf16.mxu0 %v843_v13  ;;  %v345_v13 = vrot.slane %v665_v36, %v950_v23 }
  0xcd   : > { %v487_v31 = vadd.f32 %v486_v29, %v485_v28  ;;  %vm346_vm10 = vcmp.eq.s32.totalorder %v942_v16, %v345_v13 }
  0xce   : > { %v347_v39 = vsel %vm346_vm10, 1.0, %v845_v14 }
  0xcf   : > { %v488_v34 = vsel %vm316_vm2, %v487_v31, 0.0 }
  0xd0   : > { %489 = vadd.xlane.f32.xlu1 %v488_v34 }
  0xd2   : > { %660 = vmatpush3.bf16.xpose.msk.msra.mxu0 %vm972_vm6, %v658_v35 }
  0xd3   : > { %648 = vmatprep.subr.mxu0 %v845_v14 }
  0xda   : > { %649 = vmatpush3.xpose.msk.msra.mxu0 %vm316_vm2, %v341_v38 }
  0xdd   : > { %651 = vmatmul.mubr.msk.f32.vlgmr.msra.gmra.mrb[0].mxu0 %vm316_vm2, %v347_v39 }
  0xde   : > { %765 = shalt.err (!%p762_p5)
}
  0xdf   : > { %s766_s18 = scalar_lea.hbm %s1005_s6, 64  ;;  %s770_s14 = scalar_lea.hbm %s1059_s3, 128 }
  0xe0   : > { %p767_p6 = scmp.ne.s32.totalorder %s1005_s6, %s766_s18  ;;  %p771_p10 = scmp.lt.u32.totalorder %s1005_s6, %s1059_s3 }
  0xe1   : > { %p772_p11 = scmp.lt.u32.totalorder %s770_s14, %s766_s18  ;;  %p774_p13 = scmp.lt.u32.totalorder %s766_s18, %s1005_s6 }
  0xe2   : > { %p768_p7 = pnand %p767_p6, %p912_p4 }
  0xe3   : > { %p773_p12 = por %p772_p11, %p771_p10 }
  0xe4   : > { %p769_p9 = pneg %p768_p7 }
  0xe5   : > { %p775_p0 = por %p774_p13, %p773_p12 }
  0xe7   : > { %p776_p1 = pnand %p775_p0, %p769_p9 }
  0xe9   : > { %779 = shalt.err (!%p776_p1)
}
  0xea   : > { %666 = dma.vmem_to_hbm [thread:$0]  (%p912_p4), %s519_s8, 64, %s1005_s6, %s500_s7   ;;  %v479_v14 = vld [vmem:[#allocation2] sm:$0x1] }
  0xeb   : > { %v436_v40 = vld [vmem:[%s996_s26] sm:$0xff] }
 0x15d   : > { %v490_v16 = vpop.xlane.xlu1 %489 }
 0x15e   : > { %v491_v23 = vadd.f32 %v490_v16, %v479_v14 }
 0x160   : > { %493 = vst.msk [vmem:[#allocation2] sm:$0x1] %vm235_vm1, %v491_v23 }
 0x167   : > { %v497_v44 = vld [vmem:[#allocation2] sm:$0x1] }
 0x1b0   : > { %v432_v41 = vpop.f32.mrb[0].mxu0 }
 0x1b1   : > { %v437_v42 = vadd.f32 %v436_v40, %v432_v41  ;;  %v652_v43 = vpop.f32.mrb[1].mxu0 }
 0x1b3   : > { %439 = vst.msk [vmem:[%s996_s26] sm:$0xff] %vm233_vm11, %v437_v42 }
 0x1b4   : > { %498 = vst.msk [vmem:[%s996_s26 + $0x7] sm:$0x1] %vm235_vm1, %v497_v44 }
 0x1b5 PF: > { %p672_p2 = scmp.ge.s32.totalorder %s830_s20, 2  ;;  %s533_s25 = sand.u32 1, %s810_s15  }
 0x1b6   : > { %s534_s29 = scalar_lea.sflag [#allocation4], %s533_s25 }
 0x1b7   : > { %p669_p4 = pnand %p672_p2, %p919_p8 }
 0x1b9   : > { %805 = dma.done.wait (!%p669_p4), %s534_s29, 64  }
 0x1ba   : > { %807 = vsyncadd (!%p669_p4), %s534_s29, 4294967232  ;;  %s18_s20 = sadd.s32 1, %s830_s20   ;;  %s1065_s15 = smov %s814_s16 }
 0x1bb   : > { %p15_p3 = scmp.ge.s32.totalorder %s18_s20, 4   ;;  %s1066_s16 = smov %s818_s17 }
 0x1bc   : > { %s1067_s17 = smov %s925_s28  ;;  %s1068_s18 = smov %s826_s19 }
 0x1bd   : > { %s1069_s19 = smov %s1071_s23  ;;  %17 = sbr.rel (!%p15_p3) target bundleno = 4 (0x4), region = 87 }
 0x1c4   :  { %546 = vsyncpa [#allocation4], 1 }
 0x1c5   :  { %548 = vsyncpa [#allocation4 + $0x1], 1 }

</bundles_post_ra>
